<compile_context>
chip_gen: v7x
topology: tpu7x:2x2x1
jax: 0.10.0
libtpu: 0.0.40
codegen_flags: <defaults>
</compile_context>

<pallas_src>
import functools
import math

import jax
import jax.numpy as jnp
import numpy as np
from jax import lax
from jax.experimental import pallas as pl
from jax.experimental.pallas import tpu as pltpu

_SB = 8  # sub-block rows = one sublane tile


def _round_up(v, m):
    return (v + m - 1) // m * m


def mhema_kernel(x_ref, delta_ref, alpha_ref, beta_ref, gamma_ref, omega_ref,
                 o_ref,
                 h_ref, ksb_ref, gq_ref, crev_ref, qsb_ref,
                 *, ts, sb, scale):
    """One grid step = one (lane-tile, seq-chunk).

    x_ref   : (TS, TD)  input chunk (batch folded into lanes)
    delta/alpha/beta/gamma : (N, TD) per-mode params, omega: (1, TD)
    o_ref   : (TS, TD)  output chunk
    scratch : h   (N, TD)     carried EMA mode state
              ksb (SB, SB, TD) intra sub-block causal Toeplitz
              gq  (N, SB, TD)  g * q^(i+1)
              crev(N, SB, TD)  c * q^(SB-1-j)
              qsb (N, TD)      q^SB
    """
    ct = pl.program_id(1)  # sequential chunk axis

    @pl.when(ct == 0)
    def _init():
        # --- calc_coeffs(), cheap: O(N*TD) + O(N*SB*SB*TD) exps, once per lane tile ---
        p = jax.nn.sigmoid(delta_ref[...])                     # (N, TD)
        q = 1.0 - p * jax.nn.sigmoid(alpha_ref[...])
        q = jnp.maximum(q, 1e-30)                              # guard log(0) -> NaN
        lq = jnp.log(q)                                        # <= 0
        c = p * beta_ref[...]                                  # p * beta
        g = gamma_ref[...] * scale                             # gamma * scale
        n = lq.shape[0]

        i_idx = lax.broadcasted_iota(jnp.int32, (n, sb, 1), 1).astype(jnp.float32)
        lq3 = lq[:, None, :]                                   # (N, 1, TD)
        qpow = jnp.exp(i_idx * lq3)                            # q^i      (N, SB, TD)

        gq_ref[...] = (g * q)[:, None, :] * qpow               # g * q^(i+1)
        crev_ref[...] = c[:, None, :] * jnp.exp((float(sb) - 1.0 - i_idx) * lq3)
        qsb_ref[...] = jnp.exp(float(sb) * lq)                 # q^SB     (N, TD)

        # Ksb[i, j, d] = sum_n g*c*q^(i-j) for i >= j else 0   (tiny: SB x SB x TD)
        ii = lax.broadcasted_iota(jnp.int32, (sb, sb, 1), 0)
        jj = lax.broadcasted_iota(jnp.int32, (sb, sb, 1), 1)
        diff = ii - jj                                         # (SB, SB, 1)
        dpos = jnp.maximum(diff, 0).astype(jnp.float32)        # clamp -> no exp overflow
        ksb = jnp.zeros(ksb_ref.shape, jnp.float32)
        for nn in range(n):                                    # static, small (ndim)
            gc_n = (g[nn:nn + 1, :] * c[nn:nn + 1, :])[:, None, :]   # (1, 1, TD)
            lq_n = lq[nn:nn + 1, :][:, None, :]                       # (1, 1, TD)
            ksb = ksb + gc_n * jnp.exp(dpos * lq_n)
        ksb_ref[...] = jnp.where(diff >= 0, ksb, 0.0)

        h_ref[...] = jnp.zeros_like(h_ref)                     # reset EMA state

    # Hoisted, cached tables (stay in vregs across the unrolled sub-block loop).
    omega = omega_ref[...]          # (1, TD)
    ksb = ksb_ref[...]              # (SB, SB, TD)
    gq = gq_ref[...]                # (N, SB, TD)
    crev = crev_ref[...]            # (N, SB, TD)
    qsb = qsb_ref[...]              # (N, TD)

    def body(b, h):
        row = pl.multiple_of(b * sb, sb)
        xb = x_ref[pl.ds(row, sb), :].astype(jnp.float32)          # (SB, TD)
        # intra sub-block causal conv: out_i += sum_{j<=i} kvec[i-j] * x[j]
        intra = jnp.sum(ksb * xb[None, :, :], axis=1)              # (SB, TD)
        # all history before this sub-block via mode state: sum_n g*q^(i+1)*h_n
        inter = jnp.sum(gq * h[:, None, :], axis=0)                # (SB, TD)
        y = intra + inter + xb * omega                             # residual
        o_ref[pl.ds(row, sb), :] = (y * jax.nn.sigmoid(y)).astype(o_ref.dtype)
        # state update: h_n <- q^SB * h_n + sum_j c*q^(SB-1-j) * x[j]
        return qsb * h + jnp.sum(crev * xb[None, :, :], axis=1)

    h_ref[...] = lax.fori_loop(0, ts // sb, body, h_ref[...], unroll=True)


def multi_head_ema_forward(x, delta, alpha, beta, gamma, omega, *, ndim,
                           seq_tile=None, lane_tile=128,
                           vmem_limit_bytes=32 * 1024 * 1024):
    """x: (L, B, D). delta/alpha/beta: (D, ndim, 1). gamma: (D, ndim). omega: (D,)."""
    L, B, D = x.shape
    N = ndim
    scale = math.sqrt(1.0 / ndim)
    sb = _SB

    # ---- layout: fold batch into the lane axis (row-major reshape, no transpose) ----
    BD = B * D
    td = lane_tile
    BD_pad = _round_up(BD, td)
    if seq_tile is None:
        ts = 256 if L >= 256 else _round_up(L, sb)
    else:
        ts = _round_up(seq_tile, sb)
    L_pad = _round_up(L, ts)

    x2 = jnp.pad(x.reshape(L, BD), ((0, L_pad - L), (0, BD_pad - BD)))

    def fold_param(p2d):
        # (rows, D) -> (rows, B*D) tiled so column b*D + d holds value for channel d.
        t = jnp.tile(p2d, (1, B))
        return jnp.pad(t, ((0, 0), (0, BD_pad - BD)))

    delta_f = fold_param(jnp.transpose(delta.reshape(D, N)))   # (N, BD_pad)
    alpha_f = fold_param(jnp.transpose(alpha.reshape(D, N)))
    beta_f = fold_param(jnp.transpose(beta.reshape(D, N)))
    gamma_f = fold_param(jnp.transpose(gamma.reshape(D, N)))
    omega_f = fold_param(omega.reshape(1, D))                  # (1, BD_pad)

    n_dt = BD_pad // td
    n_ct = L_pad // ts
    grid = (n_dt, n_ct)

    in_specs = [
        pl.BlockSpec((ts, td), lambda dt, ct: (ct, dt)),       # x chunk
        pl.BlockSpec((N, td), lambda dt, ct: (0, dt)),         # delta
        pl.BlockSpec((N, td), lambda dt, ct: (0, dt)),         # alpha
        pl.BlockSpec((N, td), lambda dt, ct: (0, dt)),         # beta
        pl.BlockSpec((N, td), lambda dt, ct: (0, dt)),         # gamma
        pl.BlockSpec((1, td), lambda dt, ct: (0, dt)),         # omega
    ]
    out_specs = pl.BlockSpec((ts, td), lambda dt, ct: (ct, dt))
    scratch_shapes = [
        pltpu.VMEM((N, td), jnp.float32),        # h    : carried EMA state
        pltpu.VMEM((sb, sb, td), jnp.float32),   # Ksb  : intra sub-block Toeplitz
        pltpu.VMEM((N, sb, td), jnp.float32),    # gq   : g * q^(i+1)
        pltpu.VMEM((N, sb, td), jnp.float32),    # crev : c * q^(SB-1-j)
        pltpu.VMEM((N, td), jnp.float32),        # qsb  : q^SB
    ]

    flops = float(L_pad) * BD_pad * (2.0 * sb + 4.0 * N + 8.0)
    transcendentals = (float(L_pad) * BD_pad                      # silu sigmoid
                       + float(n_dt) * td * N * sb * (sb + 3.0))  # per-tile init exps
    bytes_accessed = 4 * (2 * L_pad * BD_pad + (4 * N + 1) * BD_pad)
    cost = pl.CostEstimate(flops=int(flops),
                           transcendentals=int(transcendentals),
                           bytes_accessed=int(bytes_accessed))

    kernel = functools.partial(mhema_kernel, ts=ts, sb=sb, scale=scale)
    out_padded = pl.pallas_call(
        kernel,
        out_shape=jax.ShapeDtypeStruct((L_pad, BD_pad), x.dtype),
        grid_spec=pltpu.PrefetchScalarGridSpec(
            num_scalar_prefetch=0,
            grid=grid,
            in_specs=in_specs,
            out_specs=out_specs,
            scratch_shapes=scratch_shapes,
        ),
        compiler_params=pltpu.CompilerParams(
            # lane tiles independent (shards across v7x's 2 TCs); chunk axis carries state.
            dimension_semantics=("parallel", "arbitrary"),
            vmem_limit_bytes=vmem_limit_bytes,
        ),
        cost_estimate=cost,
    )(x2, delta_f, alpha_f, beta_f, gamma_f, omega_f)

    return out_padded[:L, :BD].reshape(L, B, D)


def _reference_forward(x, delta, alpha, beta, gamma, omega, *, ndim):
    """Pure-JAX reference mirroring the torch FFT path exactly."""
    L, B, D = x.shape
    scale = math.sqrt(1.0 / ndim)
    p = jax.nn.sigmoid(delta)                       # (D, N, 1)
    q = 1.0 - p * jax.nn.sigmoid(alpha)             # (D, N, 1)
    vander = jnp.arange(L, dtype=x.dtype).reshape(1, 1, L) * jnp.log(q)
    kern = p * beta * jnp.exp(vander)               # (D, N, L)
    k = jnp.einsum('dnl,dn->dl', kern, gamma * scale)    # (D, L)
    xt = jnp.transpose(x, (1, 2, 0))                # (B, D, L)
    k_f = jnp.fft.rfft(k, n=2 * L)
    x_f = jnp.fft.rfft(xt, n=2 * L)
    out = jnp.fft.irfft(x_f * k_f, n=2 * L)[..., :L]      # (B, D, L)
    out = jnp.transpose(out, (2, 0, 1)) + x * omega       # (L, B, D)
    return out * jax.nn.sigmoid(out)


if __name__ == "__main__":
    def make_params(key, D, N):
        # Deterministic init mirroring reset_parameters()
        k1, k2, k3, k4, k5 = jax.random.split(key, 5)
        delta = 0.2 * jax.random.normal(k1, (D, N, 1), dtype=jnp.float32)
        alpha = 0.2 * jax.random.normal(k2, (D, N, 1), dtype=jnp.float32)
        val = jnp.ones((N, 1), dtype=jnp.float32).at[1::2].set(-1.0)
        beta = 0.02 * jax.random.normal(k3, (D, N, 1), dtype=jnp.float32) + val
        gamma = jax.random.normal(k4, (D, N), dtype=jnp.float32)
        omega = jax.random.normal(k5, (D,), dtype=jnp.float32)
        return delta, alpha, beta, gamma, omega

    key = jax.random.PRNGKey(0)
    kp1, kx1, kp2, kx2 = jax.random.split(key, 4)

    # --- Case 1: seq=12, batch=2, embed_dim=16, ndim=2 (seq + lane padding) ---
    L, B, D, N = 12, 2, 16, 2
    params = make_params(kp1, D, N)
    x = jax.random.normal(kx1, (L, B, D), dtype=jnp.float32)
    ref = _reference_forward(x, *params, ndim=N)

    # Multi-chunk path (seq_tile=8 -> 2 chunks, exercises carried state + padding).
    out_chunked = jax.block_until_ready(
        multi_head_ema_forward(x, *params, ndim=N, seq_tile=8))
    np.testing.assert_allclose(np.asarray(out_chunked), np.asarray(ref),
                               rtol=2e-3, atol=2e-3)

    # Default tiling (single chunk, 2 sub-blocks).
    out_default = jax.block_until_ready(
        multi_head_ema_forward(x, *params, ndim=N))
    np.testing.assert_allclose(np.asarray(out_default), np.asarray(ref),
                               rtol=2e-3, atol=2e-3)

    # --- Case 2: seq=64, batch=2, embed_dim=128 (2 lane tiles x 2 chunks x 4 sub-blocks) ---
    L, B, D, N = 64, 2, 128, 2
    params = make_params(kp2, D, N)
    x = jax.random.normal(kx2, (L, B, D), dtype=jnp.float32)
    ref = _reference_forward(x, *params, ndim=N)
    out2 = jax.block_until_ready(
        multi_head_ema_forward(x, *params, ndim=N, seq_tile=32))
    np.testing.assert_allclose(np.asarray(out2), np.asarray(ref),
                               rtol=2e-3, atol=2e-3)

    print("KERNEL_OK")
</pallas_src>

<mosaic_0001>
module attributes {stable_mosaic.version = 11 : i64} {
  func.func @mhema_kernel(%arg0: i32, %arg1: i32, %arg2: memref<8x128xf32, #tpu.memory_space<vmem>>, %arg3: memref<2x128xf32, #tpu.memory_space<vmem>>, %arg4: memref<2x128xf32, #tpu.memory_space<vmem>>, %arg5: memref<2x128xf32, #tpu.memory_space<vmem>>, %arg6: memref<2x128xf32, #tpu.memory_space<vmem>>, %arg7: memref<1x128xf32, #tpu.memory_space<vmem>>, %arg8: memref<8x128xf32, #tpu.memory_space<vmem>>, %arg9: memref<2x128xf32, #tpu.memory_space<vmem>>, %arg10: memref<8x8x128xf32, #tpu.memory_space<vmem>>, %arg11: memref<2x8x128xf32, #tpu.memory_space<vmem>>, %arg12: memref<2x8x128xf32, #tpu.memory_space<vmem>>, %arg13: memref<2x128xf32, #tpu.memory_space<vmem>>) attributes {dimension_semantics = [#tpu.dimension_semantics<parallel>, #tpu.dimension_semantics<arbitrary>], iteration_bounds = array<i64: 1, 2>, scalar_prefetch = 0 : i64, scratch_operands = 5 : i64, tpu.core_type = #tpu.core_type<tc>, window_params = [{transform_indices = @transform_0, window_bounds = array<i64: 8, 128>}, {transform_indices = @transform_1, window_bounds = array<i64: 2, 128>}, {transform_indices = @transform_2, window_bounds = array<i64: 2, 128>}, {transform_indices = @transform_3, window_bounds = array<i64: 2, 128>}, {transform_indices = @transform_4, window_bounds = array<i64: 2, 128>}, {transform_indices = @transform_5, window_bounds = array<i64: 1, 128>}, {transform_indices = @transform_6, window_bounds = array<i64: 8, 128>}]} {
    %c0_i32 = arith.constant 0 : i32
    %0 = arith.cmpi eq, %arg1, %c0_i32 : i32
    %1 = arith.extui %0 : i1 to i32
    %c0_i32_0 = arith.constant 0 : i32
    %2 = arith.cmpi ne, %1, %c0_i32_0 : i32
    scf.if %2 {
      %c0_23 = arith.constant 0 : index
      %c0_24 = arith.constant 0 : index
      %40 = vector.load %arg3[%c0_23, %c0_24] : memref<2x128xf32, #tpu.memory_space<vmem>>, vector<2x128xf32>
      %41 = arith.negf %40 : vector<2x128xf32>
      %42 = math.exp %41 : vector<2x128xf32>
      %cst_25 = arith.constant 1.000000e+00 : f32
      %43 = vector.broadcast %cst_25 : f32 to vector<2x128xf32>
      %44 = arith.addf %43, %42 : vector<2x128xf32>
      %45 = arith.divf %43, %44 : vector<2x128xf32>
      %c0_26 = arith.constant 0 : index
      %c0_27 = arith.constant 0 : index
      %46 = vector.load %arg4[%c0_26, %c0_27] : memref<2x128xf32, #tpu.memory_space<vmem>>, vector<2x128xf32>
      %47 = arith.negf %46 : vector<2x128xf32>
      %48 = math.exp %47 : vector<2x128xf32>
      %cst_28 = arith.constant 1.000000e+00 : f32
      %49 = vector.broadcast %cst_28 : f32 to vector<2x128xf32>
      %50 = arith.addf %49, %48 : vector<2x128xf32>
      %51 = arith.divf %49, %50 : vector<2x128xf32>
      %52 = arith.mulf %45, %51 : vector<2x128xf32>
      %cst_29 = arith.constant 1.000000e+00 : f32
      %53 = vector.broadcast %cst_29 : f32 to vector<2x128xf32>
      %54 = arith.subf %53, %52 : vector<2x128xf32>
      %cst_30 = arith.constant 1.000000e-30 : f32
      %55 = vector.broadcast %cst_30 : f32 to vector<2x128xf32>
      %56 = arith.maximumf %54, %55 : vector<2x128xf32>
      %57 = math.log %56 : vector<2x128xf32>
      %c0_31 = arith.constant 0 : index
      %c0_32 = arith.constant 0 : index
      %58 = vector.load %arg5[%c0_31, %c0_32] : memref<2x128xf32, #tpu.memory_space<vmem>>, vector<2x128xf32>
      %59 = arith.mulf %45, %58 : vector<2x128xf32>
      %c0_33 = arith.constant 0 : index
      %c0_34 = arith.constant 0 : index
      %60 = vector.load %arg6[%c0_33, %c0_34] : memref<2x128xf32, #tpu.memory_space<vmem>>, vector<2x128xf32>
      %cst_35 = arith.constant 0.707106769 : f32
      %61 = vector.broadcast %cst_35 : f32 to vector<2x128xf32>
      %62 = arith.mulf %60, %61 : vector<2x128xf32>
      %63 = tpu.iota {dimensions = array<i32: 1>} : vector<2x8x1xi32>
      %64 = arith.sitofp %63 : vector<2x8x1xi32> to vector<2x8x1xf32>
      %65 = vector.shape_cast %57 : vector<2x128xf32> to vector<2x1x128xf32>
      %66 = vector.broadcast %64 : vector<2x8x1xf32> to vector<2x8x128xf32>
      %67 = vector.broadcast %65 : vector<2x1x128xf32> to vector<2x8x128xf32>
      %68 = arith.mulf %66, %67 : vector<2x8x128xf32>
      %69 = math.exp %68 : vector<2x8x128xf32>
      %70 = arith.mulf %62, %56 : vector<2x128xf32>
      %71 = vector.shape_cast %70 : vector<2x128xf32> to vector<2x1x128xf32>
      %72 = vector.broadcast %71 : vector<2x1x128xf32> to vector<2x8x128xf32>
      %73 = arith.mulf %72, %69 : vector<2x8x128xf32>
      %c0_36 = arith.constant 0 : index
      %c0_37 = arith.constant 0 : index
      %c0_38 = arith.constant 0 : index
      %74 = vector.load %arg11[%c0_36, %c0_37, %c0_38] : memref<2x8x128xf32, #tpu.memory_space<vmem>>, vector<2x8x128xf32>
      tpu.vector_store %arg11[%c0_36, %c0_37, %c0_38], %73 {strides = array<i32>} : memref<2x8x128xf32, #tpu.memory_space<vmem>>, vector<2x8x128xf32>,
      %75 = vector.shape_cast %59 : vector<2x128xf32> to vector<2x1x128xf32>
      %cst_39 = arith.constant 7.000000e+00 : f32
      %76 = vector.broadcast %cst_39 : f32 to vector<2x8x1xf32>
      %77 = arith.subf %76, %64 : vector<2x8x1xf32>
      %78 = vector.broadcast %77 : vector<2x8x1xf32> to vector<2x8x128xf32>
      %79 = vector.broadcast %65 : vector<2x1x128xf32> to vector<2x8x128xf32>
      %80 = arith.mulf %78, %79 : vector<2x8x128xf32>
      %81 = math.exp %80 : vector<2x8x128xf32>
      %82 = vector.broadcast %75 : vector<2x1x128xf32> to vector<2x8x128xf32>
      %83 = arith.mulf %82, %81 : vector<2x8x128xf32>
      %c0_40 = arith.constant 0 : index
      %c0_41 = arith.constant 0 : index
      %c0_42 = arith.constant 0 : index
      %84 = vector.load %arg12[%c0_40, %c0_41, %c0_42] : memref<2x8x128xf32, #tpu.memory_space<vmem>>, vector<2x8x128xf32>
      tpu.vector_store %arg12[%c0_40, %c0_41, %c0_42], %83 {strides = array<i32>} : memref<2x8x128xf32, #tpu.memory_space<vmem>>, vector<2x8x128xf32>,
      %cst_43 = arith.constant 8.000000e+00 : f32
      %85 = vector.broadcast %cst_43 : f32 to vector<2x128xf32>
      %86 = arith.mulf %85, %57 : vector<2x128xf32>
      %87 = math.exp %86 : vector<2x128xf32>
      %c0_44 = arith.constant 0 : index
      %c0_45 = arith.constant 0 : index
      %88 = vector.load %arg13[%c0_44, %c0_45] : memref<2x128xf32, #tpu.memory_space<vmem>>, vector<2x128xf32>
      tpu.vector_store %arg13[%c0_44, %c0_45], %87 {strides = array<i32>} : memref<2x128xf32, #tpu.memory_space<vmem>>, vector<2x128xf32>,
      %89 = tpu.iota {dimensions = array<i32: 0>} : vector<8x8x1xi32>
      %90 = tpu.iota {dimensions = array<i32: 1>} : vector<8x8x1xi32>
      %91 = arith.subi %89, %90 : vector<8x8x1xi32>
      %c0_i32_46 = arith.constant 0 : i32
      %92 = vector.broadcast %c0_i32_46 : i32 to vector<8x8x1xi32>
      %93 = arith.maxsi %91, %92 : vector<8x8x1xi32>
      %94 = arith.sitofp %93 : vector<8x8x1xi32> to vector<8x8x1xf32>
      %cst_47 = arith.constant 0.000000e+00 : f32
      %95 = vector.broadcast %cst_47 : f32 to vector<8x8x128xf32>
      %96 = vector.extract_strided_slice %62 {offsets = [0, 0], sizes = [1, 128], strides = [1, 1]} : vector<2x128xf32> to vector<1x128xf32>
      %97 = vector.extract_strided_slice %59 {offsets = [0, 0], sizes = [1, 128], strides = [1, 1]} : vector<2x128xf32> to vector<1x128xf32>
      %98 = arith.mulf %96, %97 : vector<1x128xf32>
      %99 = vector.shape_cast %98 : vector<1x128xf32> to vector<1x1x128xf32>
      %100 = vector.extract_strided_slice %57 {offsets = [0, 0], sizes = [1, 128], strides = [1, 1]} : vector<2x128xf32> to vector<1x128xf32>
      %101 = vector.shape_cast %100 : vector<1x128xf32> to vector<1x1x128xf32>
      %102 = vector.broadcast %94 : vector<8x8x1xf32> to vector<8x8x128xf32>
      %103 = vector.broadcast %101 : vector<1x1x128xf32> to vector<8x8x128xf32>
      %104 = arith.mulf %102, %103 : vector<8x8x128xf32>
      %105 = math.exp %104 : vector<8x8x128xf32>
      %106 = vector.broadcast %99 : vector<1x1x128xf32> to vector<8x8x128xf32>
      %107 = arith.mulf %106, %105 : vector<8x8x128xf32>
      %108 = arith.addf %95, %107 : vector<8x8x128xf32>
      %109 = vector.extract_strided_slice %62 {offsets = [1, 0], sizes = [1, 128], strides = [1, 1]} : vector<2x128xf32> to vector<1x128xf32>
      %110 = vector.extract_strided_slice %59 {offsets = [1, 0], sizes = [1, 128], strides = [1, 1]} : vector<2x128xf32> to vector<1x128xf32>
      %111 = arith.mulf %109, %110 : vector<1x128xf32>
      %112 = vector.shape_cast %111 : vector<1x128xf32> to vector<1x1x128xf32>
      %113 = vector.extract_strided_slice %57 {offsets = [1, 0], sizes = [1, 128], strides = [1, 1]} : vector<2x128xf32> to vector<1x128xf32>
      %114 = vector.shape_cast %113 : vector<1x128xf32> to vector<1x1x128xf32>
      %115 = vector.broadcast %94 : vector<8x8x1xf32> to vector<8x8x128xf32>
      %116 = vector.broadcast %114 : vector<1x1x128xf32> to vector<8x8x128xf32>
      %117 = arith.mulf %115, %116 : vector<8x8x128xf32>
      %118 = math.exp %117 : vector<8x8x128xf32>
      %119 = vector.broadcast %112 : vector<1x1x128xf32> to vector<8x8x128xf32>
      %120 = arith.mulf %119, %118 : vector<8x8x128xf32>
      %121 = arith.addf %108, %120 : vector<8x8x128xf32>
      %c0_i32_48 = arith.constant 0 : i32
      %122 = vector.broadcast %c0_i32_48 : i32 to vector<8x8x1xi32>
      %123 = arith.cmpi sge, %91, %122 : vector<8x8x1xi32>
      %cst_49 = arith.constant 0.000000e+00 : f32
      %124 = vector.shape_cast %123 : vector<8x8x1xi1> to vector<8x8x1xi1>
      %125 = vector.broadcast %124 : vector<8x8x1xi1> to vector<8x8x128xi1>
      %126 = vector.broadcast %cst_49 : f32 to vector<8x8x128xf32>
      %127 = arith.select %125, %121, %126 : vector<8x8x128xi1>, vector<8x8x128xf32>
      %c0_50 = arith.constant 0 : index
      %c0_51 = arith.constant 0 : index
      %c0_52 = arith.constant 0 : index
      %128 = vector.load %arg10[%c0_50, %c0_51, %c0_52] : memref<8x8x128xf32, #tpu.memory_space<vmem>>, vector<8x8x128xf32>
      tpu.vector_store %arg10[%c0_50, %c0_51, %c0_52], %127 {strides = array<i32>} : memref<8x8x128xf32, #tpu.memory_space<vmem>>, vector<8x8x128xf32>,
      %cst_53 = arith.constant 0.000000e+00 : f32
      %129 = vector.broadcast %cst_53 : f32 to vector<2x128xf32>
      %c0_54 = arith.constant 0 : index
      %c0_55 = arith.constant 0 : index
      %130 = vector.load %arg9[%c0_54, %c0_55] : memref<2x128xf32, #tpu.memory_space<vmem>>, vector<2x128xf32>
      tpu.vector_store %arg9[%c0_54, %c0_55], %129 {strides = array<i32>} : memref<2x128xf32, #tpu.memory_space<vmem>>, vector<2x128xf32>,
    } else {
    }
    %c0 = arith.constant 0 : index
    %c0_1 = arith.constant 0 : index
    %3 = vector.load %arg7[%c0, %c0_1] : memref<1x128xf32, #tpu.memory_space<vmem>>, vector<1x128xf32>
    %c0_2 = arith.constant 0 : index
    %c0_3 = arith.constant 0 : index
    %c0_4 = arith.constant 0 : index
    %4 = vector.load %arg10[%c0_2, %c0_3, %c0_4] : memref<8x8x128xf32, #tpu.memory_space<vmem>>, vector<8x8x128xf32>
    %c0_5 = arith.constant 0 : index
    %c0_6 = arith.constant 0 : index
    %c0_7 = arith.constant 0 : index
    %5 = vector.load %arg11[%c0_5, %c0_6, %c0_7] : memref<2x8x128xf32, #tpu.memory_space<vmem>>, vector<2x8x128xf32>
    %c0_8 = arith.constant 0 : index
    %c0_9 = arith.constant 0 : index
    %c0_10 = arith.constant 0 : index
    %6 = vector.load %arg12[%c0_8, %c0_9, %c0_10] : memref<2x8x128xf32, #tpu.memory_space<vmem>>, vector<2x8x128xf32>
    %c0_11 = arith.constant 0 : index
    %c0_12 = arith.constant 0 : index
    %7 = vector.load %arg13[%c0_11, %c0_12] : memref<2x128xf32, #tpu.memory_space<vmem>>, vector<2x128xf32>
    %c0_13 = arith.constant 0 : index
    %c0_14 = arith.constant 0 : index
    %8 = vector.load %arg9[%c0_13, %c0_14] : memref<2x128xf32, #tpu.memory_space<vmem>>, vector<2x128xf32>
    %c0_i32_15 = arith.constant 0 : i32
    %c8_i32 = arith.constant 8 : i32
    %9 = arith.muli %c0_i32_15, %c8_i32 : i32
    %10 = tpu.assume_multiple %9, 8 : i32
    %11 = arith.index_cast %10 : i32 to index
    %c0_16 = arith.constant 0 : index
    %12 = vector.load %arg2[%11, %c0_16] : memref<8x128xf32, #tpu.memory_space<vmem>>, vector<8x128xf32>
    %13 = vector.shape_cast %12 : vector<8x128xf32> to vector<1x8x128xf32>
    %14 = vector.broadcast %13 : vector<1x8x128xf32> to vector<8x8x128xf32>
    %15 = arith.mulf %4, %14 : vector<8x8x128xf32>
    %cst = arith.constant dense<0.000000e+00> : vector<8x128xf32>
    %16 = vector.multi_reduction <add>, %15, %cst [1] : vector<8x8x128xf32> to vector<8x128xf32>
    %17 = vector.shape_cast %8 : vector<2x128xf32> to vector<2x1x128xf32>
    %18 = vector.broadcast %17 : vector<2x1x128xf32> to vector<2x8x128xf32>
    %19 = arith.mulf %5, %18 : vector<2x8x128xf32>
    %cst_17 = arith.constant dense<0.000000e+00> : vector<8x128xf32>
    %20 = vector.multi_reduction <add>, %19, %cst_17 [0] : vector<2x8x128xf32> to vector<8x128xf32>
    %21 = arith.addf %16, %20 : vector<8x128xf32>
    %22 = vector.broadcast %3 : vector<1x128xf32> to vector<8x128xf32>
    %23 = arith.mulf %12, %22 : vector<8x128xf32>
    %24 = arith.addf %21, %23 : vector<8x128xf32>
    %25 = arith.negf %24 : vector<8x128xf32>
    %26 = math.exp %25 : vector<8x128xf32>
    %cst_18 = arith.constant 1.000000e+00 : f32
    %27 = vector.broadcast %cst_18 : f32 to vector<8x128xf32>
    %28 = arith.addf %27, %26 : vector<8x128xf32>
    %29 = arith.divf %27, %28 : vector<8x128xf32>
    %30 = arith.mulf %24, %29 : vector<8x128xf32>
    %31 = arith.index_cast %10 : i32 to index
    %c0_19 = arith.constant 0 : index
    %32 = vector.load %arg8[%31, %c0_19] : memref<8x128xf32, #tpu.memory_space<vmem>>, vector<8x128xf32>
    tpu.vector_store %arg8[%31, %c0_19], %30 {strides = array<i32>} : memref<8x128xf32, #tpu.memory_space<vmem>>, vector<8x128xf32>,
    %33 = arith.mulf %7, %8 : vector<2x128xf32>
    %34 = vector.shape_cast %12 : vector<8x128xf32> to vector<1x8x128xf32>
    %35 = vector.broadcast %34 : vector<1x8x128xf32> to vector<2x8x128xf32>
    %36 = arith.mulf %6, %35 : vector<2x8x128xf32>
    %cst_20 = arith.constant dense<0.000000e+00> : vector<2x128xf32>
    %37 = vector.multi_reduction <add>, %36, %cst_20 [1] : vector<2x8x128xf32> to vector<2x128xf32>
    %38 = arith.addf %33, %37 : vector<2x128xf32>
    %c1_i32 = arith.constant 1 : i32
    %c0_21 = arith.constant 0 : index
    %c0_22 = arith.constant 0 : index
    %39 = vector.load %arg9[%c0_21, %c0_22] : memref<2x128xf32, #tpu.memory_space<vmem>>, vector<2x128xf32>
    tpu.vector_store %arg9[%c0_21, %c0_22], %38 {strides = array<i32>} : memref<2x128xf32, #tpu.memory_space<vmem>>, vector<2x128xf32>,
    return
  }
  func.func @transform_0(%arg0: i32, %arg1: i32) -> (i32, i32) {
    %c0_i32 = arith.constant 0 : i32
    return %arg1, %arg0 : i32, i32
  }
  func.func @transform_1(%arg0: i32, %arg1: i32) -> (i32, i32) {
    %c0_i32 = arith.constant 0 : i32
    %c0_i32_0 = arith.constant 0 : i32
    return %c0_i32, %arg0 : i32, i32
  }
  func.func @transform_2(%arg0: i32, %arg1: i32) -> (i32, i32) {
    %c0_i32 = arith.constant 0 : i32
    %c0_i32_0 = arith.constant 0 : i32
    return %c0_i32, %arg0 : i32, i32
  }
  func.func @transform_3(%arg0: i32, %arg1: i32) -> (i32, i32) {
    %c0_i32 = arith.constant 0 : i32
    %c0_i32_0 = arith.constant 0 : i32
    return %c0_i32, %arg0 : i32, i32
  }
  func.func @transform_4(%arg0: i32, %arg1: i32) -> (i32, i32) {
    %c0_i32 = arith.constant 0 : i32
    %c0_i32_0 = arith.constant 0 : i32
    return %c0_i32, %arg0 : i32, i32
  }
  func.func @transform_5(%arg0: i32, %arg1: i32) -> (i32, i32) {
    %c0_i32 = arith.constant 0 : i32
    %c0_i32_0 = arith.constant 0 : i32
    return %c0_i32, %arg0 : i32, i32
  }
  func.func @transform_6(%arg0: i32, %arg1: i32) -> (i32, i32) {
    %c0_i32 = arith.constant 0 : i32
    return %arg1, %arg0 : i32, i32
  }
}

</mosaic_0001>

<bundles_post_ra>
// kernel: tpu_custom_call.1
= control target key start
LH: loop header
LB: loop body
LE: loop exit
PB: predicated region body
PF: predicated region fallthrough
CT: control target
= control target key end

     0   :  { %11 = vsyncpa [#allocation8], 0  ;;  %s1817_s0 = inlined_call_operand.hbm [shape: f32[16,128], index: 0, kind: input, shape index: {}]   ;;  %s1818_s1 = inlined_call_operand.vmem [shape: f32[2,128], index: 1, kind: input, shape index: {}]   ;;  %s1819_s2 = inlined_call_operand.vmem [shape: f32[2,128], index: 2, kind: input, shape index: {}]   ;;  %s1820_s3 = inlined_call_operand.vmem [shape: f32[2,128], index: 3, kind: input, shape index: {}]   ;;  %s1821_s4 = inlined_call_operand.vmem [shape: f32[2,128], index: 4, kind: input, shape index: {}]   ;;  %s1822_s5 = inlined_call_operand.vmem [shape: f32[1,128], index: 5, kind: input, shape index: {}]   ;;  %s1823_s6 = inlined_call_operand.hbm [shape: f32[16,128], index: 6, kind: output, shape index: {}]  }
   0x1   :  { %13 = vsyncpa [#allocation8 + $0x1], 0 }
   0x2   :  { %14 = vsyncpa [#allocation9], 0 }
   0x3   :  { %16 = vsyncpa [#allocation9 + $0x1], 0  ;;  %s1476_s21 = smov 0   ;;  %s1478_s22 = smov 0  }
   0x4   :  { %s1480_s23 = smov 0   ;;  %s1482_s24 = smov 0  }
   0x5   :  { %s1484_s25 = smov 0   ;;  %s1486_s26 = smov 0  }
   0x6 LB: > { %s1129_s27 = sadd.s32 4294967295, %s1434_s26   ;;  %s1130_s28 = sadd.s32 4294967294, %s1434_s26   ;;  %s1434_s26 = sphi %s1486_s26, %s22_s26   ;;  %s1430_s25 = sphi %s1484_s25, %s1839_s25   ;;  %s1426_s24 = sphi %s1482_s24, %s1838_s24   ;;  %s1422_s23 = sphi %s1480_s23, %s1837_s23   ;;  %s1418_s22 = sphi %s1478_s22, %s1836_s22   ;;  %s1414_s21 = sphi %s1476_s21, %s1835_s21  }
   0x7   : > { %s31_s29 = sadd.s32 1, %s1430_s25  ;;  %s43_s30 = sadd.s32 1, %s1422_s23 }
   0x8   : > { %p32_p0 = scmp.ge.s32.totalorder %s31_s29, 2  ;;  %p50_p1 = scmp.ne.s32.totalorder %s1422_s23, %s1418_s22 }
   0x9   : > { %p51_p2 = scmp.eq.s32.totalorder %s1434_s26, 0  ;;  %p56_p3 = scmp.ne.s32.totalorder %s1418_s22, %s1414_s21 }
   0xa   : > { %s1841_s29 = smov (%p32_p0, %s31_s29), 0  ;;  %p57_p5 = scmp.eq.s32.totalorder %s1129_s27, 0 }
   0xb   : > { %p1517_p4 = por %p51_p2, %p50_p1  ;;  %s38_s8 = ssub.s32 %s1430_s25, %s1841_s29 }
   0xc   : > { %p212_p6 = scmp.eq.s32.totalorder %s1129_s27, 1  ;;  %p41_p7 = scmp.eq.s32.totalorder %s38_s8, 0 }
   0xd   : > { %p1523_p8 = por %p57_p5, %p56_p3  ;;  %p218_p10 = scmp.eq.s32.totalorder %s1130_s28, 1 }
   0xe   : > { %p1527_p9 = por %p212_p6, %p50_p1  ;;  %p1185_p13 = scmp.lt.s32.totalorder %s1434_s26, 2 }
   0xf   : > { %s1532_s11 = scalar_select %p41_p7, %s1422_s23, %s43_s30  }
  0x10   : > { %s1827_s10 = scalar_select %p1527_p9, 1, 0 }
  0x11   : > { %p1534_p11 = por %p218_p10, %p56_p3  ;;  %s272_s13 = sand.u32 1, %s1422_s23  }
  0x12   : > { %s1138_s14 = sshll.u32 %s272_s13, 3  ;;  %s1139_s15 = sshll.u32 %s1430_s25, 7 }
  0x13   : > { %s1828_s12 = scalar_select %p1534_p11, 1, 0 }
  0x14   : > { %s1545_s18 = scalar_lea.hbm %s1817_s0, %s1139_s15  ;;  %s276_s19 = scalar_lea.vmem [#allocation7], %s1138_s14 }
  0x15   : > { %s284_s20 = sshll.u32 %s276_s19, 4  ;;  %p1551_p0 = pnand %p1185_p13, %p1517_p4  ;;  %s1547_s20 = int_to_ptr.vmem [resolvable:$true] %s284_s20 }
  0x16   : > { %s273_s28 = scalar_lea.sflag [#allocation8], %s272_s13  ;;  %s1322_s30 = scalar_lea.hbm %s1545_s18, 128 }
  0x17   : > { %p1323_p3 = scmp.ne.s32.totalorder %s1545_s18, %s1322_s30  ;;  %p1324_p5 = pneg %p1551_p0 }
  0x18   : > { %s1327_s7 = scalar_lea.hbm %s1817_s0, 256  ;;  %p1328_p4 = scmp.lt.u32.totalorder %s1545_s18, %s1817_s0 }
  0x19   : > { %p1325_p6 = pnand %p1324_p5, %p1323_p3  ;;  %p1329_p10 = scmp.lt.u32.totalorder %s1327_s7, %s1322_s30 }
  0x1a   : > { %p1331_p12 = scmp.lt.u32.totalorder %s1322_s30, %s1545_s18 }
  0x1b   : > { %p1326_p7 = pneg %p1325_p6  ;;  %p1330_p13 = por %p1329_p10, %p1328_p4 }
  0x1d   : > { %p1332_p1 = por %p1331_p12, %p1330_p13 }
  0x1f   : > { %p1333_p2 = pnand %p1332_p1, %p1326_p7 }
  0x21   : > { %1336 = shalt.err (!%p1333_p2)
}
  0x22   : > { %s1337_s13 = scalar_lea.vmem %s1547_s20, 128  ;;  %s1436_s17 = smov [#allocation7]  }
  0x23   : > { %p1338_p3 = scmp.ne.s32.totalorder %s1547_s20, %s1337_s13  ;;  %s1342_s19 = sshll.u32 %s1436_s17, 4  ;;  %s1343_s19 = int_to_ptr.vmem [resolvable:$false] %s1342_s19 }
  0x24   : > { %s1344_s8 = scalar_lea.vmem %s1343_s19, 256  ;;  %p1345_p9 = scmp.lt.s32.totalorder %s1547_s20, %s1343_s19 }
  0x25   : > { %p1340_p6 = pnand %p1338_p3, %p1324_p5  ;;  %p1346_p4 = scmp.lt.s32.totalorder %s1344_s8, %s1337_s13 }
  0x27   : > { %p1341_p11 = pneg %p1340_p6  ;;  %p1347_p10 = por %p1346_p4, %p1345_p9 }
  0x29   : > { %p1348_p12 = pnand %p1347_p10, %p1341_p11 }
  0x2b   : > { %1351 = shalt.err (!%p1348_p12)
}
  0x2c   : > { %1180 = dma.hbm_to_vmem [thread:$0]  (!%p1551_p0), %s1545_s18, 128, %s1547_s20, %s273_s28  }
  0x2d   : > { %p1830_p1 = scmp.lt.s32.totalorder %s1434_s26, 3  ;;  %p1831_p2 = scmp.ge.s32.totalorder %s1434_s26, 1 }
  0x2f   : > { %p290_p5 = pnand %p1831_p2, %p1830_p1 }
  0x30   : > { %s1587_s30 = sand.u32 (!%p290_p5), 1, %s1418_s22  }
  0x31   : > { %293 = sbr.rel (%p290_p5) target bundleno = 229 (0xe5), region = 44  ;;  %s1141_s14 = sshll.u32 (!%p290_p5), %s1587_s30, 3 }
  0x32   : > { %s296_s7 = scalar_lea.sflag (!%p290_p5), [#allocation8], %s1587_s30  ;;  %s1591_s15 = scalar_lea.vmem (!%p290_p5), [#allocation7], %s1141_s14 }
  0x38   : > { %1405 = dma.done.wait (%p1523_p8), %s296_s7, 128  }
  0x39   : > { %1407 = vsyncadd (%p1523_p8), %s296_s7, 4294967168  ;;  %s1597_s18 = scalar_lea.vmem [#allocation10], %s1141_s14  ;;  %p1143_p9 = scmp.ne.s32.totalorder %s1426_s24, 0 }
  0x3a   : > { %v370_v0 = vld [vmem:[%s1818_s1] sm:$0x3] (!%p1143_p9)  ;;  %v1437_v4 = vmov (!%p1143_p9), 0.0   ;;  %v393_v12 = vlaneseq (!%p1143_p9)  ;;  %v1438_v16 = vmov (!%p1143_p9), 1966171168  }
  0x3b   : > { %369 = sbr.rel (%p1143_p9) target bundleno = 147 (0x93), region = 52  ;;  %v377_v1 = vld [vmem:[%s1819_s2] sm:$0x3] (!%p1143_p9)  ;;  %v1144_v2 = vmul.f32 (!%p1143_p9), -1.442695, %v370_v0  ;;  %v398_v17 = vunpack.c.l.s4 (!%p1143_p9), %v1438_v16 }
  0x3c   : > { %v1145_v3 = vmul.f32 (!%p1143_p9), -1.442695, %v377_v1  ;;  %690 = vst [vmem:[#allocation2] sm:$0x3] (!%p1143_p9), %v1437_v4  ;;  %v394_v15 = vshrl.u32 (!%p1143_p9), %v393_v12, 7 }
  0x3d   : > { %1238 = vpow2.f32 (!%p1143_p9), %v1144_v2  ;;  %v391_v20 = vld [vmem:[%s1821_s4] sm:$0x3] (!%p1143_p9)  ;;  %v399_v24 = vunpack.c.0.s8 (!%p1143_p9), %v398_v17 }
  0x3e   : > { %1240 = vpow2.f32 (!%p1143_p9), %v1145_v3  ;;  %v1606_v18 = vsub.s32 (!%p1143_p9), 1, %v394_v15  ;;  %v1608_v19 = vsub.s32 (!%p1143_p9), 2, %v394_v15  ;;  %v1613_v21 = vcvt.s32.f32 (!%p1143_p9), %v394_v15  ;;  %v389_v25 = vld [vmem:[%s1820_s3] sm:$0x3] (!%p1143_p9) }
  0x3f   : > { %v1615_v22 = vsub.s32 (!%p1143_p9), 3, %v394_v15  ;;  %v1617_v23 = vsub.s32 (!%p1143_p9), 4, %v394_v15  ;;  %v1625_v28 = vsub.s32 (!%p1143_p9), 5, %v394_v15  ;;  %v1627_v29 = vsub.s32 (!%p1143_p9), 6, %v394_v15 }
  0x40   : > { %vm531_vm0 = vcmp.gt.s32.totalorder (!%p1143_p9), %v1606_v18, 0  ;;  %v1146_v26 = vcvt.s32.f32 (!%p1143_p9), %v1606_v18  ;;  %v1148_v27 = vcvt.s32.f32 (!%p1143_p9), %v1608_v19  ;;  %v528_v30 = vsub.s32 (!%p1143_p9), 7, %v394_v15 }
  0x41   : > { %v392_v31 = vmul.f32 (!%p1143_p9), 0.70710677, %v391_v20  ;;  %v1629_v32 = vsub.s32 (!%p1143_p9), 0, %v394_v15  ;;  %vm533_vm1 = vcmp.gt.s32.totalorder (!%p1143_p9), %v1608_v19, 0  ;;  %v496_v34 = vsub.f32 (!%p1143_p9), 7.0, %v1613_v21 }
  0x42   : > { %v1150_v35 = vcvt.s32.f32 %v1615_v22  ;;  %v1152_v36 = vcvt.s32.f32 %v1617_v23  ;;  %v1635_v37 = vsub.s32 %v399_v24, %v394_v15  ;;  %v1147_v38 = vsel %vm531_vm0, %v1146_v26, 0.0 }
  0x43   : > { %vm535_vm2 = vcmp.gt.s32.totalorder %v1615_v22, 0  ;;  %vm537_vm3 = vcmp.gt.s32.totalorder %v1617_v23, 0  ;;  %v1149_v40 = vsel %vm533_vm1, %v1148_v27, 0.0  ;;  %v1154_v41 = vcvt.s32.f32 %v1625_v28 }
  0x44   : > { %v1156_v42 = vcvt.s32.f32 %v1627_v29  ;;  %v1158_v43 = vcvt.s32.f32 %v528_v30  ;;  %vm539_vm4 = vcmp.gt.s32.totalorder %v1625_v28, 0  ;;  %vm541_vm5 = vcmp.gt.s32.totalorder %v1627_v29, 0 }
  0x45   : > { %vm543_vm6 = vcmp.gt.s32.totalorder %v528_v30, 0  ;;  %v1151_v47 = vsel %vm535_vm2, %v1150_v35, 0.0  ;;  %v1153_v48 = vsel %vm537_vm3, %v1152_v36, 0.0  ;;  %v1155_v54 = vsel %vm539_vm4, %v1154_v41, 0.0 }
  0x46   : > { %v1652_v55 = vsel %vm541_vm5, %v1156_v42, 0.0  ;;  %v1654_v56 = vsel %vm543_vm6, %v1158_v43, 0.0  ;;  %vm650_vm7 = vcmp.ge.s32.totalorder %v1629_v32, 0  ;;  %vm651_vm8 = vcmp.ge.s32.totalorder %v1606_v18, 0 }
  0x47   : > { %v1239_v5 = vpop.eup %1238  ;;  %vm652_vm9 = vcmp.ge.s32.totalorder %v1608_v19, 0  ;;  %vm653_vm10 = vcmp.ge.s32.totalorder %v1615_v22, 0  ;;  %vm654_vm11 = vcmp.ge.s32.totalorder %v1617_v23, 0  ;;  %vm655_vm12 = vcmp.ge.s32.totalorder %v1625_v28, 0 }
  0x48   : > { %v1241_v6 = vpop.eup %1240  ;;  %v374_v7 = vadd.f32 1.0, %v1239_v5  ;;  %vm656_vm13 = vcmp.ge.s32.totalorder %v1627_v29, 0 }
  0x49   : > { %v381_v8 = vadd.f32 1.0, %v1241_v6 }
  0x4a   : > { %1242 = vrcp.f32 %v374_v7 }
  0x4b   : > { %1244 = vrcp.f32 %v381_v8 }
  0x54   : > { %v1243_v9 = vpop.eup %1242 }
  0x55   : > { %v1245_v10 = vpop.eup %1244  ;;  %v390_v33 = vmul.f32 %v1243_v9, %v389_v25 }
  0x56   : > { %v384_v11 = vmul.f32 %v1245_v10, %v1243_v9 }
  0x57   : > { %v480_v45 = vrot.slane %v390_v33, %v1635_v37  ;;  %v553_v46 = vmul.f32 %v392_v31, %v390_v33 }
  0x58   : > { %v385_v13 = vsub.f32 1.0, %v384_v11 }
  0x59   : > { %v488_v53 = vrot.slane %v480_v45, %v1635_v37  ;;  %v1659_v62 = vrot.slane %v553_v46, %v1629_v32  ;;  %v1666_v4 = vrot.slane %v553_v46, %v1606_v18  ;;  %v481_v20 = vcombine.high %v480_v45, %v480_v45 }
  0x5a   : > { %v386_v14 = vmax.f32 %v385_v13, 1e-30 }
  0x5b   : > { %v495_v42 = vrot.slane %v481_v20, %v1635_v37 }
  0x5c   : > { %1246 = vlog2.f32 %v386_v14  ;;  %v435_v61 = vmul.f32 %v392_v31, %v386_v14 }
  0x5e   : > { %v443_v11 = vrot.slane %v435_v61, %v1635_v37 }
  0x60   : > { %v444_v31 = vcombine.high %v443_v11, %v443_v11  ;;  %v451_v36 = vrot.slane %v443_v11, %v1635_v37 }
  0x62   : > { %v458_v45 = vrot.slane %v444_v31, %v1635_v37 }
  0x66   : > { %v1247_v39 = vpop.eup %1246 }
  0x67   : > { %v388_v44 = vmul.f32 0.6931472, %v1247_v39 }
  0x69   : > { %v403_v49 = vrot.slane %v388_v44, %v1635_v37  ;;  %v1646_v50 = vrot.slane %v388_v44, %v1629_v32  ;;  %v1649_v51 = vrot.slane %v388_v44, %v1606_v18  ;;  %v517_v52 = vmul.f32 8.0, %v388_v44 }
  0x6b   : > { %v411_v57 = vrot.slane %v403_v49, %v1635_v37  ;;  %v404_v58 = vcombine.high %v403_v49, %v403_v49  ;;  %v518_v59 = vmul.f32 1.442695, %v517_v52  ;;  %v558_v60 = vmul.f32 0.0, %v1646_v50 }
  0x6c   : > { %v606_v63 = vmul.f32 0.0, %v1649_v51  ;;  %v559_v0 = vmul.f32 %v1147_v38, %v1646_v50  ;;  %v607_v7 = vmul.f32 %v1147_v38, %v1649_v51  ;;  %v560_v12 = vmul.f32 %v1149_v40, %v1646_v50 }
  0x6d   : > { %v422_v1 = vrot.slane %v411_v57, %v1629_v32  ;;  %v418_v2 = vrot.slane %v404_v58, %v1635_v37  ;;  %1248 = vpow2.f32 %v518_v59  ;;  %v566_v3 = vmul.f32 1.442695, %v558_v60 }
  0x6e   : > { %v614_v5 = vmul.f32 1.442695, %v606_v63  ;;  %v568_v6 = vmul.f32 1.442695, %v559_v0  ;;  %v608_v13 = vmul.f32 %v1149_v40, %v1649_v51  ;;  %v616_v24 = vmul.f32 1.442695, %v607_v7 }
  0x6f   : > { %v429_v8 = vmul.f32 %v422_v1, %v1613_v21  ;;  %v426_v9 = vrot.slane %v418_v2, %v1629_v32  ;;  %v497_v10 = vmul.f32 %v496_v34, %v422_v1  ;;  %1250 = vpow2.f32 %v566_v3 }
  0x70   : > { %1252 = vpow2.f32 %v614_v5  ;;  %v561_v25 = vmul.f32 %v1151_v47, %v1646_v50  ;;  %v609_v30 = vmul.f32 %v1151_v47, %v1649_v51  ;;  %v570_v33 = vmul.f32 1.442695, %v560_v12 }
  0x71   : > { %v431_v14 = vmul.f32 1.442695, %v429_v8  ;;  %v430_v15 = vmul.f32 %v426_v9, %v1613_v21  ;;  %v499_v16 = vmul.f32 1.442695, %v497_v10  ;;  %v498_v17 = vmul.f32 %v496_v34, %v426_v9 }
  0x72   : > { %1254 = vpow2.f32 %v568_v6  ;;  %v562_v35 = vmul.f32 %v1153_v48, %v1646_v50  ;;  %v618_v21 = vmul.f32 1.442695, %v608_v13  ;;  %v610_v34 = vmul.f32 %v1153_v48, %v1649_v51 }
  0x73   : > { %1256 = vpow2.f32 %v431_v14  ;;  %v433_v26 = vmul.f32 1.442695, %v430_v15  ;;  %v501_v27 = vmul.f32 1.442695, %v498_v17  ;;  %v506_v38 = vrot.slane %v488_v53, %v1629_v32 }
  0x74   : > { %1258 = vpow2.f32 %v499_v16  ;;  %v572_v39 = vmul.f32 1.442695, %v561_v25  ;;  %v563_v40 = vmul.f32 %v1155_v54, %v1646_v50  ;;  %v620_v43 = vmul.f32 1.442695, %v609_v30 }
  0x75   : > { %1260 = vpow2.f32 %v433_v26  ;;  %v611_v44 = vmul.f32 %v1155_v54, %v1649_v51  ;;  %v574_v46 = vmul.f32 1.442695, %v562_v35  ;;  %v564_v47 = vmul.f32 %v1652_v55, %v1646_v50 }
  0x76   : > { %1262 = vpow2.f32 %v501_v27  ;;  %v462_v49 = vrot.slane %v451_v36, %v1629_v32  ;;  %v622_v52 = vmul.f32 1.442695, %v610_v34  ;;  %v612_v53 = vmul.f32 %v1652_v55, %v1649_v51 }
  0x77   : > { %v1249_v41 = vpop.eup %1248  ;;  %1264 = vpow2.f32 %v616_v24  ;;  %v576_v54 = vmul.f32 1.442695, %v563_v40  ;;  %v565_v37 = vmul.f32 %v1654_v56, %v1646_v50  ;;  %v624_v60 = vmul.f32 1.442695, %v611_v44 }
  0x78   : > { %520 = vst [vmem:[#allocation6] sm:$0x3] %v1249_v41  ;;  %1266 = vpow2.f32 %v570_v33  ;;  %v613_v61 = vmul.f32 %v1654_v56, %v1649_v51  ;;  %v466_v0 = vrot.slane %v458_v45, %v1629_v32  ;;  %v578_v55 = vmul.f32 1.442695, %v564_v47 }
  0x79   : > { %v1251_v48 = vpop.eup %1250  ;;  %1268 = vpow2.f32 %v618_v21  ;;  %v510_v2 = vrot.slane %v495_v42, %v1629_v32  ;;  %v626_v50 = vmul.f32 1.442695, %v612_v53  ;;  %v580_v7 = vmul.f32 1.442695, %v565_v37 }
  0x7a   : > { %v1253_v57 = vpop.eup %1252  ;;  %v586_v58 = vmul.f32 %v1251_v48, %v1659_v62  ;;  %1270 = vpow2.f32 %v572_v39  ;;  %v628_v56 = vmul.f32 1.442695, %v613_v61 }
  0x7b   : > { %v634_v59 = vmul.f32 %v1253_v57, %v1666_v4  ;;  %1272 = vpow2.f32 %v620_v43 }
  0x7c   : > { %v1255_v63 = vpop.eup %1254  ;;  %1274 = vpow2.f32 %v574_v46 }
  0x7d   : > { %v1257_v1 = vpop.eup %1256  ;;  %v642_v3 = vadd.f32 %v634_v59, %v586_v58  ;;  %1276 = vpow2.f32 %v622_v52  ;;  %v587_v12 = vmul.f32 %v1255_v63, %v1659_v62 }
  0x7e   : > { %v1259_v5 = vpop.eup %1258  ;;  %v469_v6 = vmul.f32 %v1257_v1, %v462_v49  ;;  %1278 = vpow2.f32 %v576_v54 }
  0x7f   : > { %v1261_v8 = vpop.eup %1260  ;;  %v513_v9 = vmul.f32 %v1259_v5, %v506_v38  ;;  %v674_v51 = vsel %vm650_vm7, %v642_v3, 0.0  ;;  %1280 = vpow2.f32 %v624_v60 }
  0x80   : > { %v1263_v10 = vpop.eup %1262  ;;  %471 = vst [vmem:[#allocation4] sm:$0xff] %v469_v6  ;;  %v470_v11 = vmul.f32 %v1261_v8, %v466_v0  ;;  %682 = vst [vmem:[#allocation3] sm:$0xff] %v674_v51  ;;  %1282 = vpow2.f32 %v578_v55 }
  0x81   : > { %v1265_v32 = vpop.eup %1264  ;;  %515 = vst [vmem:[#allocation5] sm:$0xff] %v513_v9  ;;  %v514_v13 = vmul.f32 %v1263_v10, %v510_v2  ;;  %1284 = vpow2.f32 %v626_v50 }
  0x82   : > { %v1267_v14 = vpop.eup %1266  ;;  %472 = vst [vmem:[#allocation4 + $0x8] sm:$0xff] %v470_v11  ;;  %v635_v15 = vmul.f32 %v1265_v32, %v1666_v4  ;;  %1286 = vpow2.f32 %v580_v7 }
  0x83   : > { %v1269_v16 = vpop.eup %1268  ;;  %516 = vst [vmem:[#allocation5 + $0x8] sm:$0xff] %v514_v13  ;;  %v588_v17 = vmul.f32 %v1267_v14, %v1659_v62  ;;  %1288 = vpow2.f32 %v628_v56 }
  0x84   : > { %v1271_v20 = vpop.eup %1270  ;;  %v643_v24 = vadd.f32 %v635_v15, %v587_v12  ;;  %v636_v25 = vmul.f32 %v1269_v16, %v1666_v4 }
  0x85   : > { %v1273_v26 = vpop.eup %1272  ;;  %v589_v27 = vmul.f32 %v1271_v20, %v1659_v62 }
  0x86   : > { %v1275_v30 = vpop.eup %1274  ;;  %v675_v31 = vsel %vm651_vm8, %v643_v24, 0.0  ;;  %v644_v33 = vadd.f32 %v636_v25, %v588_v17  ;;  %v637_v35 = vmul.f32 %v1273_v26, %v1666_v4 }
  0x87   : > { %v1277_v36 = vpop.eup %1276  ;;  %683 = vst [vmem:[#allocation3 + $0x8] sm:$0xff] %v675_v31  ;;  %v590_v18 = vmul.f32 %v1275_v30, %v1659_v62 }
  0x88   : > { %v1279_v21 = vpop.eup %1278  ;;  %v676_v34 = vsel %vm652_vm9, %v644_v33, 0.0  ;;  %v645_v38 = vadd.f32 %v637_v35, %v589_v27  ;;  %v638_v39 = vmul.f32 %v1277_v36, %v1666_v4 }
  0x89   : > { %v1281_v40 = vpop.eup %1280  ;;  %684 = vst [vmem:[#allocation3 + $0x10] sm:$0xff] %v676_v34  ;;  %v591_v19 = vmul.f32 %v1279_v21, %v1659_v62 }
  0x8a   : > { %v1283_v41 = vpop.eup %1282  ;;  %v677_v42 = vsel %vm653_vm10, %v645_v38, 0.0  ;;  %v646_v43 = vadd.f32 %v638_v39, %v590_v18  ;;  %v639_v44 = vmul.f32 %v1281_v40, %v1666_v4 }
  0x8b   : > { %v1285_v45 = vpop.eup %1284  ;;  %685 = vst [vmem:[#allocation3 + $0x18] sm:$0xff] %v677_v42  ;;  %v592_v22 = vmul.f32 %v1283_v41, %v1659_v62 }
  0x8c   : > { %v1287_v46 = vpop.eup %1286  ;;  %v678_v47 = vsel %vm654_vm11, %v646_v43, 0.0  ;;  %v647_v48 = vadd.f32 %v639_v44, %v591_v19  ;;  %v640_v49 = vmul.f32 %v1285_v45, %v1666_v4 }
  0x8d   : > { %v1289_v52 = vpop.eup %1288  ;;  %686 = vst [vmem:[#allocation3 + $0x20] sm:$0xff] %v678_v47  ;;  %v593_v23 = vmul.f32 %v1287_v46, %v1659_v62 }
  0x8e   : > { %v679_v53 = vsel %vm655_vm12, %v647_v48, 0.0  ;;  %v648_v57 = vadd.f32 %v640_v49, %v592_v22  ;;  %v641_v58 = vmul.f32 %v1289_v52, %v1666_v4 }
  0x8f   : > { %687 = vst [vmem:[#allocation3 + $0x28] sm:$0xff] %v679_v53 }
  0x90   : > { %v680_v54 = vsel %vm656_vm13, %v648_v57, 0.0  ;;  %v649_v28 = vadd.f32 %v641_v58, %v593_v23 }
  0x91   : > { %688 = vst [vmem:[#allocation3 + $0x30] sm:$0xff] %v680_v54 }
  0x92   : > { %689 = vst [vmem:[#allocation3 + $0x38] sm:$0xff] %v649_v28 }
  0x93 PF: > { %v692_v37 = vld [vmem:[#allocation3] sm:$0xff]  ;;  %v693_v59 = vld [vmem:[#allocation3 + $0x8] sm:$0xff]  ;;  %v694_v60 = vld [vmem:[#allocation3 + $0x10] sm:$0xff]  ;;  %v1439_v1 = vmov 1966171168   ;;  %v767_v4 = vlaneseq  ;;  %vm919_vm14 = vcmask 1041409  }
  0x94   : > { %v695_v61 = vld [vmem:[#allocation3 + $0x18] sm:$0xff]  ;;  %v696_v63 = vld [vmem:[#allocation3 + $0x20] sm:$0xff]  ;;  %v765_v2 = vunpack.c.l.s4 %v1439_v1  ;;  %v702_v19 = vld [vmem:[#allocation5] sm:$0xff]  ;;  %vm922_vm15 = vcmask 1042434   ;;  %vm925_vm0 = vcmask 1043459   ;;  %vm928_vm1 = vcmask 1044484  }
  0x95   : > { %v1720_v62 = vld [vmem:[%s1591_s15] sm:$0xff]  ;;  %v768_v31 = vshrl.u32 %v767_v4, 7  ;;  %v1730_v41 = vld [vmem:[#allocation2] sm:$0x3]  ;;  %vm931_vm2 = vcmask 1045509   ;;  %vm934_vm3 = vcmask 1046534  }
  0x96   : > { %v697_v0 = vld [vmem:[#allocation3 + $0x28] sm:$0xff]  ;;  %v707_v3 = vmul.f32 %v1720_v62, %v692_v37  ;;  %v708_v50 = vmul.f32 %v1720_v62, %v693_v59  ;;  %v709_v5 = vmul.f32 %v1720_v62, %v694_v60  ;;  %v710_v6 = vmul.f32 %v1720_v62, %v695_v61  ;;  %v703_v44 = vld [vmem:[#allocation5 + $0x8] sm:$0xff]  ;;  %v700_v61 = vld [vmem:[#allocation4] sm:$0xff]  ;;  %s1170_s7 = sshll.u32 %s1426_s24, 7  ;;  %s977_s15 = sshll.u32 %s1597_s18, 4  ;;  %s1769_s15 = int_to_ptr.vmem [resolvable:$true] %s977_s15 }
  0x97   : > { %v711_v7 = vmul.f32 %v1720_v62, %v696_v63  ;;  %v712_v8 = vmul.f32 %v1720_v62, %v697_v0  ;;  %v766_v30 = vunpack.c.0.s8 %v765_v2  ;;  %v788_v23 = vsub.s32 0, %v768_v31  ;;  %v1160_v28 = vld [vmem:[%s1822_s5] ss:$0 sm:$0xff]  ;;  %s1767_s28 = scalar_lea.hbm %s1823_s6, %s1170_s7  ;;  %s963_s24 = scalar_lea.sflag [#allocation9], %s1587_s30 }
  0x98   : > { %v698_v29 = vld [vmem:[#allocation3 + $0x30] sm:$0xff]  ;;  %v715_v56 = vrot.slane %v707_v3, 4  ;;  %v721_v10 = vrot.slane %v708_v50, 4  ;;  %v727_v11 = vrot.slane %v709_v5, 4  ;;  %v733_v12 = vrot.slane %v710_v6, 4  ;;  %s1352_s16 = scalar_lea.vmem %s1769_s15, 128 }
  0x99   : > { %v699_v55 = vld [vmem:[#allocation3 + $0x38] sm:$0xff]  ;;  %v713_v9 = vmul.f32 %v1720_v62, %v698_v29  ;;  %v739_v32 = vrot.slane %v711_v7, 4  ;;  %v745_v13 = vrot.slane %v712_v8, 4  ;;  %v769_v40 = vsub.s32 %v766_v30, %v768_v31  ;;  %p1353_p8 = scmp.ne.s32.totalorder %s1769_s15, %s1352_s16  ;;  %p1832_p11 = scmp.ne.s32.totalorder %s1827_s10, 0 }
  0x9a   : > { %v714_v51 = vmul.f32 %v1720_v62, %v699_v55  ;;  %v716_v16 = vadd.f32 %v715_v56, %v707_v3  ;;  %v722_v17 = vadd.f32 %v721_v10, %v708_v50  ;;  %v728_v20 = vadd.f32 %v727_v11, %v709_v5  ;;  %v701_v50 = vld [vmem:[#allocation4 + $0x8] sm:$0xff]  ;;  %s1440_s9 = smov [#allocation10]  }
  0x9b   : > { %v751_v14 = vrot.slane %v713_v9, 4  ;;  %v734_v24 = vadd.f32 %v733_v12, %v710_v6  ;;  %v740_v25 = vadd.f32 %v739_v32, %v711_v7  ;;  %v746_v26 = vadd.f32 %v745_v13, %v712_v8  ;;  %p1354_p0 = pnand %p1353_p8, %p1832_p11  ;;  %s1356_s13 = sshll.u32 %s1440_s9, 4  ;;  %s1357_s13 = int_to_ptr.vmem [resolvable:$false] %s1356_s13 }
  0x9c   : > { %v757_v15 = vrot.slane %v714_v51, 4  ;;  %v717_v33 = vrot.slane %v716_v16, 2  ;;  %v723_v36 = vrot.slane %v722_v17, 2  ;;  %v729_v18 = vrot.slane %v728_v20, 2  ;;  %s1358_s17 = scalar_lea.vmem %s1357_s13, 256  ;;  %p1359_p13 = scmp.lt.s32.totalorder %s1769_s15, %s1357_s13 }
  0x9d   : > { %v752_v27 = vadd.f32 %v751_v14, %v713_v9  ;;  %v735_v21 = vrot.slane %v734_v24, 2  ;;  %v741_v34 = vrot.slane %v740_v25, 2  ;;  %v747_v38 = vrot.slane %v746_v26, 2  ;;  %p1355_p7 = pneg %p1354_p0  ;;  %p1360_p3 = scmp.lt.s32.totalorder %s1358_s17, %s1352_s16 }
  0x9e   : > { %v758_v35 = vadd.f32 %v757_v15, %v714_v51  ;;  %v718_v42 = vadd.f32 %v717_v33, %v716_v16  ;;  %v724_v45 = vadd.f32 %v723_v36, %v722_v17  ;;  %v730_v22 = vadd.f32 %v729_v18, %v728_v20 }
  0x9f   : > { %v753_v39 = vrot.slane %v752_v27, 2  ;;  %v736_v46 = vadd.f32 %v735_v21, %v734_v24  ;;  %v742_v47 = vadd.f32 %v741_v34, %v740_v25  ;;  %v748_v48 = vadd.f32 %v747_v38, %v746_v26  ;;  %p1361_p6 = por %p1360_p3, %p1359_p13 }
  0xa0   : > { %v759_v43 = vrot.slane %v758_v35, 2  ;;  %v770_v52 = vrot.slane %v1730_v41, %v769_v40  ;;  %v942_v53 = vmul.f32 %v1720_v62, %v702_v19  ;;  %v719_v57 = vrot.slane %v718_v42, 1 }
  0xa1   : > { %v754_v49 = vadd.f32 %v753_v39, %v752_v27  ;;  %v943_v54 = vmul.f32 %v1720_v62, %v703_v44  ;;  %v725_v37 = vrot.slane %v724_v45, 1  ;;  %v731_v63 = vrot.slane %v730_v22, 1  ;;  %p1362_p4 = pnand %p1361_p6, %p1355_p7 }
  0xa2   : > { %v760_v58 = vadd.f32 %v759_v43, %v758_v35  ;;  %v771_v59 = vcombine.high %v770_v52, %v770_v52  ;;  %v778_v60 = vrot.slane %v770_v52, %v769_v40  ;;  %v737_v0 = vrot.slane %v736_v46, 1 }
  0xa3   : > { %v743_v29 = vrot.slane %v742_v47, 1  ;;  %v749_v55 = vrot.slane %v748_v48, 1  ;;  %v755_v1 = vrot.slane %v754_v49, 1  ;;  %v944_v3 = vrot.slane %v942_v53, 4 }
  0xa4   : > { %v785_v2 = vrot.slane %v771_v59, %v769_v40  ;;  %v789_v4 = vrot.slane %v778_v60, %v788_v23  ;;  %v720_v5 = vadd.f32 %v719_v57, %v718_v42  ;;  %v761_v6 = vrot.slane %v760_v58, 1 }
  0xa5   : > { %v829_v7 = vmul.f32 %v1160_v28, %v1720_v62  ;;  %v950_v8 = vrot.slane %v943_v54, 4  ;;  %v726_v9 = vadd.f32 %v725_v37, %v724_v45  ;;  %v945_v10 = vadd.f32 %v944_v3, %v942_v53 }
  0xa6   : > { %v793_v51 = vrot.slane %v785_v2, %v788_v23  ;;  %v796_v56 = vmul.f32 %v789_v4, %v700_v61  ;;  %v732_v11 = vadd.f32 %v731_v63, %v730_v22  ;;  %v738_v12 = vadd.f32 %v737_v0, %v736_v46 }
  0xa7   : > { %v744_v32 = vadd.f32 %v743_v29, %v742_v47  ;;  %v951_v13 = vadd.f32 %v950_v8, %v943_v54  ;;  %v750_v14 = vadd.f32 %v749_v55, %v748_v48  ;;  %v756_v15 = vadd.f32 %v755_v1, %v754_v49  ;;  %v704_v54 = vld [vmem:[#allocation6] sm:$0x3] }
  0xa8   : > { %v797_v16 = vmul.f32 %v793_v51, %v701_v50  ;;  %v946_v17 = vrot.slane %v945_v10, 2  ;;  %v762_v20 = vadd.f32 %v761_v6, %v760_v58  ;;  %v831_v24 = vrot.slane %v829_v7, 1 }
  0xa9   : > { %v832_v25 = vrot.slane %v829_v7, 2  ;;  %v952_v26 = vrot.slane %v951_v13, 2  ;;  %v833_v30 = vrot.slane %v829_v7, 3  ;;  %v834_v62 = vrot.slane %v829_v7, 4 }
  0xaa   : > { %v798_v27 = vadd.f32 %v797_v16, %v796_v56  ;;  %v835_v31 = vrot.slane %v829_v7, 5  ;;  %v836_v33 = vrot.slane %v829_v7, 6  ;;  %v837_v35 = vrot.slane %v829_v7, 7 }
  0xab   : > { %v947_v36 = vadd.f32 %v946_v17, %v945_v10  ;;  %v953_v18 = vadd.f32 %v952_v26, %v951_v13  ;;  %v941_v3 = vmul.f32 %v1730_v41, %v704_v54  ;;  %vm937_vm4 = vcmask 1047559  }
  0xac   : > { %v800_v21 = vrot.slane %v798_v27, 1  ;;  %v801_v34 = vrot.slane %v798_v27, 2  ;;  %v802_v38 = vrot.slane %v798_v27, 3  ;;  %v803_v39 = vrot.slane %v798_v27, 4 }
  0xad   : > { %v804_v40 = vrot.slane %v798_v27, 5  ;;  %v805_v19 = vrot.slane %v798_v27, 6  ;;  %v806_v42 = vrot.slane %v798_v27, 7  ;;  %v815_v43 = vadd.f32 %v798_v27, %v720_v5 }
  0xae   : > { %v816_v44 = vadd.f32 %v800_v21, %v726_v9  ;;  %v817_v45 = vadd.f32 %v801_v34, %v732_v11  ;;  %v818_v22 = vadd.f32 %v802_v38, %v738_v12  ;;  %v819_v46 = vadd.f32 %v803_v39, %v744_v32 }
  0xaf   : > { %v820_v47 = vadd.f32 %v804_v40, %v750_v14  ;;  %v821_v48 = vadd.f32 %v805_v19, %v756_v15  ;;  %v822_v49 = vadd.f32 %v806_v42, %v762_v20  ;;  %v846_v52 = vadd.f32 %v829_v7, %v815_v43 }
  0xb0   : > { %v847_v23 = vadd.f32 %v831_v24, %v816_v44  ;;  %v848_v53 = vadd.f32 %v832_v25, %v817_v45  ;;  %v1739_v57 = vadd.f32 %v833_v30, %v818_v22  ;;  %v1741_v58 = vadd.f32 %v834_v62, %v819_v46 }
  0xb1   : > { %v1743_v28 = vadd.f32 %v835_v31, %v820_v47  ;;  %v1745_v37 = vadd.f32 %v836_v33, %v821_v48  ;;  %v1161_v59 = vmul.f32 -1.442695, %v846_v52  ;;  %v1747_v60 = vadd.f32 %v837_v35, %v822_v49 }
  0xb2   : > { %v1162_v61 = vmul.f32 -1.442695, %v847_v23  ;;  %v1163_v63 = vmul.f32 -1.442695, %v848_v53  ;;  %v1164_v0 = vmul.f32 -1.442695, %v1739_v57 }
  0xb3   : > { %1290 = vpow2.f32 %v1161_v59  ;;  %v1165_v29 = vmul.f32 -1.442695, %v1741_v58  ;;  %v1166_v55 = vmul.f32 -1.442695, %v1743_v28  ;;  %v948_v1 = vrot.slane %v947_v36, 1 }
  0xb4   : > { %1292 = vpow2.f32 %v1162_v61  ;;  %v954_v2 = vrot.slane %v953_v18, 1  ;;  %v1167_v4 = vmul.f32 -1.442695, %v1745_v37  ;;  %v1168_v50 = vmul.f32 -1.442695, %v1747_v60 }
  0xb5   : > { %1294 = vpow2.f32 %v1163_v63  ;;  %v949_v5 = vadd.f32 %v948_v1, %v947_v36 }
  0xb6   : > { %1296 = vpow2.f32 %v1164_v0  ;;  %v955_v6 = vadd.f32 %v954_v2, %v953_v18 }
  0xb7   : > { %1298 = vpow2.f32 %v1165_v29 }
  0xb8   : > { %1300 = vpow2.f32 %v1166_v55  ;;  %v958_v7 = vsel %vm919_vm14, %v955_v6, %v949_v5 }
  0xb9   : > { %1302 = vpow2.f32 %v1167_v4  ;;  %v960_v8 = vadd.f32 %v958_v7, %v941_v3 }
  0xba   : > { %1304 = vpow2.f32 %v1168_v50 }
  0xbb   : > { %961 = vst [vmem:[#allocation2] sm:$0x3] %v960_v8 }
  0xbd   : > { %v1291_v9 = vpop.eup %1290 }
  0xbe   : > { %v1293_v51 = vpop.eup %1292  ;;  %v878_v56 = vadd.f32 1.0, %v1291_v9 }
  0xbf   : > { %v1295_v10 = vpop.eup %1294  ;;  %v879_v11 = vadd.f32 1.0, %v1293_v51 }
  0xc0   : > { %v1297_v41 = vpop.eup %1296  ;;  %v880_v12 = vadd.f32 1.0, %v1295_v10  ;;  %1306 = vrcp.f32 %v878_v56 }
  0xc1   : > { %v1299_v32 = vpop.eup %1298  ;;  %v881_v13 = vadd.f32 1.0, %v1297_v41  ;;  %1308 = vrcp.f32 %v879_v11 }
  0xc2   : > { %v1301_v14 = vpop.eup %1300  ;;  %v882_v15 = vadd.f32 1.0, %v1299_v32  ;;  %1310 = vrcp.f32 %v880_v12 }
  0xc3   : > { %v1303_v16 = vpop.eup %1302  ;;  %v883_v17 = vadd.f32 1.0, %v1301_v14  ;;  %1312 = vrcp.f32 %v881_v13 }
  0xc4   : > { %v1305_v20 = vpop.eup %1304  ;;  %v884_v24 = vadd.f32 1.0, %v1303_v16  ;;  %1314 = vrcp.f32 %v882_v15 }
  0xc5   : > { %v885_v25 = vadd.f32 1.0, %v1305_v20  ;;  %1316 = vrcp.f32 %v883_v17 }
  0xc6   : > { %1318 = vrcp.f32 %v884_v24 }
  0xc7   : > { %1320 = vrcp.f32 %v885_v25 }
  0xca   : > { %v1307_v26 = vpop.eup %1306 }
  0xcb   : > { %v1309_v27 = vpop.eup %1308  ;;  %v902_v62 = vmul.f32 %v1307_v26, %v846_v52 }
  0xcc   : > { %v1311_v30 = vpop.eup %1310  ;;  %v903_v31 = vmul.f32 %v1309_v27, %v847_v23 }
  0xcd   : > { %v1313_v33 = vpop.eup %1312  ;;  %v904_v35 = vmul.f32 %v1311_v30, %v848_v53 }
  0xce   : > { %v1315_v36 = vpop.eup %1314  ;;  %v905_v18 = vmul.f32 %v1313_v33, %v1739_v57  ;;  %v918_v21 = vrot.slane %v903_v31, 7 }
  0xcf   : > { %v1317_v34 = vpop.eup %1316  ;;  %v906_v38 = vmul.f32 %v1315_v36, %v1741_v58  ;;  %v921_v39 = vrot.slane %v904_v35, 6 }
  0xd0   : > { %v1319_v40 = vpop.eup %1318  ;;  %v907_v19 = vmul.f32 %v1317_v34, %v1743_v28  ;;  %v920_v42 = vsel %vm919_vm14, %v918_v21, %v902_v62  ;;  %v924_v43 = vrot.slane %v905_v18, 5 }
  0xd1   : > { %v1321_v44 = vpop.eup %1320  ;;  %v908_v45 = vmul.f32 %v1319_v40, %v1745_v37  ;;  %v923_v22 = vsel %vm922_vm15, %v921_v39, %v920_v42  ;;  %v927_v46 = vrot.slane %v906_v38, 4 }
  0xd2   : > { %v909_v47 = vmul.f32 %v1321_v44, %v1747_v60  ;;  %v926_v48 = vsel %vm925_vm0, %v924_v43, %v923_v22  ;;  %v930_v49 = vrot.slane %v907_v19, 3 }
  0xd3   : > { %v929_v52 = vsel %vm928_vm1, %v927_v46, %v926_v48  ;;  %v933_v23 = vrot.slane %v908_v45, 2 }
  0xd4   : > { %v932_v53 = vsel %vm931_vm2, %v930_v49, %v929_v52  ;;  %v936_v57 = vrot.slane %v909_v47, 1 }
  0xd5   : > { %v935_v58 = vsel %vm934_vm3, %v933_v23, %v932_v53 }
  0xd6   : > { %v938_v54 = vsel %vm937_vm4, %v936_v57, %v935_v58 }
  0xd7   : > { %940 = vst [vmem:[%s1597_s18] sm:$0xff] %v938_v54 }
  0xd8   : > { %1365 = shalt.err (!%p1362_p4)
}
  0xd9   : > { %s1366_s30 = scalar_lea.hbm %s1767_s28, 128  ;;  %s1370_s8 = scalar_lea.hbm %s1823_s6, 256 }
  0xda   : > { %p1367_p10 = scmp.ne.s32.totalorder %s1767_s28, %s1366_s30  ;;  %p1371_p2 = scmp.lt.u32.totalorder %s1767_s28, %s1823_s6 }
  0xdb   : > { %p1372_p5 = scmp.lt.u32.totalorder %s1370_s8, %s1366_s30  ;;  %p1374_p8 = scmp.lt.u32.totalorder %s1366_s30, %s1767_s28 }
  0xdc   : > { %p1368_p12 = pnand %p1367_p10, %p1832_p11 }
  0xdd   : > { %p1373_p9 = por %p1372_p5, %p1371_p2 }
  0xde   : > { %p1369_p1 = pneg %p1368_p12 }
  0xdf   : > { %p1375_p0 = por %p1374_p8, %p1373_p9 }
  0xe1   : > { %p1376_p7 = pnand %p1375_p0, %p1369_p1 }
  0xe3   : > { %1379 = shalt.err (!%p1376_p7)
}
  0xe4   : > { %1175 = dma.vmem_to_hbm [thread:$0]  (%p1832_p11), %s1769_s15, 128, %s1767_s28, %s963_s24  }
  0xe5 PF: > { %s989_s20 = sand.u32 1, %s1414_s21   ;;  %p1833_p13 = scmp.ne.s32.totalorder %s1828_s12, 0 }
  0xe6   : > { %p1834_p3 = scmp.ge.s32.totalorder %s1434_s26, 2  ;;  %s990_s27 = scalar_lea.sflag [#allocation9], %s989_s20 }
  0xe8   : > { %p1182_p6 = pnand %p1834_p3, %p1833_p13 }
  0xea   : > { %1409 = dma.done.wait (!%p1182_p6), %s990_s27, 128  }
  0xeb   : > { %1411 = vsyncadd (!%p1182_p6), %s990_s27, 4294967168  ;;  %s22_s26 = sadd.s32 1, %s1434_s26   ;;  %s1835_s21 = smov %s1418_s22 }
  0xec   : > { %p19_p4 = scmp.ge.s32.totalorder %s22_s26, 4   ;;  %s1836_s22 = smov %s1422_s23 }
  0xed   : > { %s1837_s23 = smov %s1532_s11  ;;  %s1838_s24 = smov %s1430_s25 }
  0xee   : > { %s1839_s25 = smov %s1841_s29  ;;  %21 = sbr.rel (!%p19_p4) target bundleno = 6 (0x6), region = 108 }
  0xf5   :  { %995 = vsyncpa [#allocation8], 1 }
  0xf6   :  { %997 = vsyncpa [#allocation8 + $0x1], 1 }
  0xf7   :  { %998 = vsyncpa [#allocation9], 1 }
  0xf8   :  { %1000 = vsyncpa [#allocation9 + $0x1], 1 }

</bundles_post_ra>
